<compile_context>
chip_gen: v7x
topology: tpu7x:2x2x1
jax: 0.10.0
libtpu: 0.0.40
codegen_flags: <defaults>
</compile_context>

<pallas_src>
import math

import jax
import jax.numpy as jnp
from jax.experimental import pallas as pl
from jax.experimental.pallas import tpu as pltpu

NEGATIVE_SLOPE = 0.2
SCALE = math.sqrt(2.0)

LANE = 1024                 # lane-dense minor axis: large multiple of 128
BLOCK_BYTES = 4 << 20       # ~4 MiB per block regardless of dtype
VMEM_LIMIT_BYTES = 40 << 20 # covers 2x(in+out) 4 MiB blocks on every gen


def _round_up(n: int, m: int) -> int:
    return ((n + m - 1) // m) * m


def _scaled_leaky_relu_kernel(x_ref, o_ref):
    x = x_ref[...]
    # Fused select-multiply: leaky_relu(x) * sqrt(2).  Python-float constants
    # are weakly typed, so bf16 inputs stay bf16 on the VPU.
    scale = jnp.where(x >= 0, SCALE, SCALE * NEGATIVE_SLOPE)
    o_ref[...] = (x * scale).astype(o_ref.dtype)


def _jnp_epilogue(v: jax.Array) -> jax.Array:
    """Plain-JAX fallback for tiny tails (< LANE elements)."""
    scale = jnp.where(v >= 0, SCALE, SCALE * NEGATIVE_SLOPE)
    return (v * scale).astype(v.dtype)


def scaled_leaky_relu(x: jax.Array) -> jax.Array:
    orig_shape = x.shape
    total = x.size
    if total == 0:
        return x

    flat = x.reshape(-1)
    rows = total // LANE          # full lane-dense rows
    main_total = rows * LANE
    tail_n = total - main_total   # < LANE leftover elements

    if rows == 0:
        # Entire tensor is smaller than one lane row: not worth a kernel.
        return _jnp_epilogue(flat).reshape(orig_shape)

    main = flat if tail_n == 0 else flat[:main_total]
    x2d = main.reshape(rows, LANE)

    itemsize = x.dtype.itemsize
    sublane = {4: 8, 2: 16, 1: 32}.get(itemsize, 8)
    tm_max = max(sublane, (BLOCK_BYTES // (LANE * itemsize)) // sublane * sublane)

    if rows <= sublane:
        # Tiny tensor: one full-array block (allowed even if rows % 8 != 0).
        tm = rows
    else:
        # Cap at half the rows (rounded to sublane packing) so the grid has
        # >= 2 blocks for v7x's two TensorCores whenever possible.
        tm = min(tm_max, _round_up(pl.cdiv(rows, 2), sublane))

    grid = (pl.cdiv(rows, tm),)   # ragged last block handled by Pallas masking

    cost = pl.CostEstimate(
        flops=3 * main_total,                        # cmp + select + mul
        transcendentals=0,
        bytes_accessed=2 * main_total * itemsize,    # read + write
    )

    out2d = pl.pallas_call(
        _scaled_leaky_relu_kernel,
        out_shape=jax.ShapeDtypeStruct((rows, LANE), x.dtype),
        grid=grid,
        in_specs=[pl.BlockSpec((tm, LANE), lambda i: (i, 0))],
        out_specs=pl.BlockSpec((tm, LANE), lambda i: (i, 0)),
        compiler_params=pltpu.CompilerParams(
            dimension_semantics=("parallel",),
            vmem_limit_bytes=VMEM_LIMIT_BYTES,
        ),
        cost_estimate=cost,
        # TODO(synk): expose input_output_aliases={0: 0} when callers can
        # donate x — halves HBM footprint for large activations.
    )(x2d)

    out_flat = out2d.reshape(-1)
    if tail_n:
        out_flat = jnp.concatenate([out_flat, _jnp_epilogue(flat[main_total:])])
    return out_flat.reshape(orig_shape)


def _reference(x: jax.Array) -> jax.Array:
    return (jnp.where(x >= 0, x, x * NEGATIVE_SLOPE) * SCALE).astype(x.dtype)


if __name__ == "__main__":
    key = jax.random.PRNGKey(0)

    # Primary check: NCHW shape matching the module's typical use.
    x = jax.random.normal(key, (2, 4, 16, 16), dtype=jnp.float32)
    out = jax.block_until_ready(scaled_leaky_relu(x))
    assert out.shape == x.shape and out.dtype == x.dtype
    assert jnp.allclose(out, _reference(x), atol=1e-5, rtol=1e-5)

    # Secondary check: ragged size exercising multi-block grid + tail epilogue.
    x2 = jax.random.normal(jax.random.PRNGKey(1), (2, 3, 40, 40), dtype=jnp.float32)
    out2 = jax.block_until_ready(scaled_leaky_relu(x2))
    assert out2.shape == x2.shape and out2.dtype == x2.dtype
    assert jnp.allclose(out2, _reference(x2), atol=1e-5, rtol=1e-5)

    print("KERNEL_OK")
</pallas_src>

<mosaic_0001>
module attributes {stable_mosaic.version = 11 : i64} {
  func.func @_scaled_leaky_relu_kernel(%arg0: i32, %arg1: memref<2x1024xf32, #tpu.memory_space<vmem>>, %arg2: memref<2x1024xf32, #tpu.memory_space<vmem>>) attributes {dimension_semantics = [#tpu.dimension_semantics<parallel>], iteration_bounds = array<i64: 1>, scalar_prefetch = 0 : i64, scratch_operands = 0 : i64, tpu.core_type = #tpu.core_type<tc>, window_params = [{transform_indices = @transform_0, window_bounds = array<i64: 2, 1024>}, {transform_indices = @transform_1, window_bounds = array<i64: 2, 1024>}]} {
    %c0 = arith.constant 0 : index
    %c0_0 = arith.constant 0 : index
    %0 = vector.load %arg1[%c0, %c0_0] : memref<2x1024xf32, #tpu.memory_space<vmem>>, vector<2x1024xf32>
    %cst = arith.constant 0.000000e+00 : f32
    %1 = vector.broadcast %cst : f32 to vector<2x1024xf32>
    %2 = arith.cmpf oge, %0, %1 : vector<2x1024xf32>
    %cst_1 = arith.constant 1.41421354 : f32
    %cst_2 = arith.constant 0.282842726 : f32
    %3 = vector.broadcast %cst_1 : f32 to vector<2x1024xf32>
    %4 = vector.broadcast %cst_2 : f32 to vector<2x1024xf32>
    %5 = arith.select %2, %3, %4 : vector<2x1024xi1>, vector<2x1024xf32>
    %6 = arith.mulf %0, %5 : vector<2x1024xf32>
    %c0_3 = arith.constant 0 : index
    %c0_4 = arith.constant 0 : index
    %7 = vector.load %arg2[%c0_3, %c0_4] : memref<2x1024xf32, #tpu.memory_space<vmem>>, vector<2x1024xf32>
    tpu.vector_store %arg2[%c0_3, %c0_4], %6 {strides = array<i32>} : memref<2x1024xf32, #tpu.memory_space<vmem>>, vector<2x1024xf32>,
    return
  }
  func.func @transform_0(%arg0: i32) -> (i32, i32) {
    %c0_i32 = arith.constant 0 : i32
    %c0_i32_0 = arith.constant 0 : i32
    return %arg0, %c0_i32 : i32, i32
  }
  func.func @transform_1(%arg0: i32) -> (i32, i32) {
    %c0_i32 = arith.constant 0 : i32
    %c0_i32_0 = arith.constant 0 : i32
    return %arg0, %c0_i32 : i32, i32
  }
}

</mosaic_0001>

<bundles_post_ra>
// kernel: tpu_custom_call.1
= control target key start
LH: loop header
LB: loop body
LE: loop exit
PB: predicated region body
PF: predicated region fallthrough
CT: control target
= control target key end

     0   :  { %6 = vsyncpa [#allocation3], 0  ;;  %s134_s0 = inlined_call_operand.hbm [shape: f32[2,1024], index: 0, kind: input, shape index: {}]   ;;  %s135_s1 = inlined_call_operand.hbm [shape: f32[2,1024], index: 1, kind: output, shape index: {}]  }
   0x1   :  { %7 = vsyncpa [#allocation4], 0  ;;  %s97_s6 = smov [#allocation2]   ;;  %s49_s10 = scalar_lea.hbm %s134_s0, 256 }
   0x2   :  { %s14_s7 = sshll.u32 %s97_s6, 4  ;;  %p50_p0 = scmp.ne.s32.totalorder %s134_s0, %s49_s10  ;;  %s15_s7 = int_to_ptr.vmem [resolvable:$true] %s14_s7 }
   0x3   :  { %p53_p1 = scmp.lt.u32.totalorder %s49_s10, %s134_s0 }
   0x5   :  { %p55_p2 = pnand %p53_p1, %p50_p0 }
   0x7   :  { %58 = shalt.err (!%p55_p2)
}
   0x8   :  { %s59_s15 = scalar_lea.vmem %s15_s7, 256  ;;  %p64_p4 = scmp.lt.s32.totalorder %s15_s7, %s15_s7 }
   0x9   :  { %p60_p3 = scmp.ne.s32.totalorder %s15_s7, %s59_s15  ;;  %p65_p5 = scmp.lt.s32.totalorder %s59_s15, %s59_s15 }
   0xb   :  { %p66_p6 = por %p65_p5, %p64_p4 }
   0xd   :  { %p67_p7 = pnand %p66_p6, %p60_p3 }
   0xf   :  { %70 = shalt.err (!%p67_p7)
}
  0x10   :  { %17 = dma.hbm_to_vmem [thread:$0]  %s134_s0, 256, %s15_s7, [#allocation3]  }
  0x11   :  { %93 = dma.done.wait [#allocation3], 256  }
  0x12   :  { %94 = vsyncadd [#allocation3], 4294967040  ;;  %v21_v0 = vld [vmem:[#allocation2] sm:$0xff]  ;;  %v22_v1 = vld [vmem:[#allocation2 + $0x8] sm:$0xff]  ;;  %s98_s18 = smov [#allocation5]  }
  0x13   :  { %s37_s19 = sshll.u32 %s98_s18, 4  ;;  %vm23_vm0 = vcmp.ge.f32.partialorder %v21_v0, 0.0  ;;  %vm24_vm1 = vcmp.ge.f32.partialorder %v22_v1, 0.0  ;;  %v99_v2 = vmov 0.28284273   ;;  %s38_s19 = int_to_ptr.vmem [resolvable:$true] %s37_s19 }
  0x14   :  { %v25_v3 = vsel %vm23_vm0, 1.4142135, %v99_v2  ;;  %v26_v4 = vsel %vm24_vm1, 1.4142135, %v99_v2  ;;  %s71_s20 = scalar_lea.vmem %s38_s19, 256  ;;  %p76_p9 = scmp.lt.s32.totalorder %s38_s19, %s38_s19 }
  0x15   :  { %v27_v5 = vmul.f32 %v25_v3, %v21_v0  ;;  %v28_v6 = vmul.f32 %v26_v4, %v22_v1  ;;  %p72_p8 = scmp.ne.s32.totalorder %s38_s19, %s71_s20  ;;  %p77_p10 = scmp.lt.s32.totalorder %s71_s20, %s71_s20 }
  0x17   :  { %29 = vst [vmem:[#allocation5] sm:$0xff] %v27_v5  ;;  %30 = vst [vmem:[#allocation5 + $0x8] sm:$0xff] %v28_v6  ;;  %p78_p11 = por %p77_p10, %p76_p9 }
  0x19   :  { %p79_p12 = pnand %p78_p11, %p72_p8 }
  0x1b   :  { %82 = shalt.err (!%p79_p12)
}
  0x1c   :  { %s83_s22 = scalar_lea.hbm %s135_s1, 256 }
  0x1d   :  { %p84_p13 = scmp.ne.s32.totalorder %s135_s1, %s83_s22  ;;  %p87_p0 = scmp.lt.u32.totalorder %s83_s22, %s135_s1 }
  0x1f   :  { %p89_p1 = pnand %p87_p0, %p84_p13 }
  0x21   :  { %92 = shalt.err (!%p89_p1)
}
  0x22   :  { %40 = dma.vmem_to_hbm [thread:$0]  %s38_s19, 256, %s135_s1, [#allocation4]  }
  0x23   :  { %95 = dma.done.wait [#allocation4], 256  }
  0x24   :  { %96 = vsyncadd [#allocation4], 4294967040 }
  0x25   :  { %44 = vsyncpa [#allocation3], 1 }
  0x26   :  { %45 = vsyncpa [#allocation4], 1 }

</bundles_post_ra>
